<compile_context>
chip_gen: v5e
topology: v5e:2x2
jax: 0.10.0
libtpu: 0.0.40
codegen_flags: <defaults>
</compile_context>

<pallas_src>
import functools

import jax
import jax.numpy as jnp
from jax.experimental import pallas as pl
from jax.experimental.pallas import tpu as pltpu

# Demo shapes consistent with the module's eval-mode forward.
B, T = 2, 64                 # batch, max time
D = 128                      # cfg.dim (conformer model dim), lane-aligned
TARGET_SIZE = 31             # cfg.target_size
V = TARGET_SIZE + 1          # final_linear output dim = target_size + 1 = 32
V_PAD = 128                  # lane-dense padded vocab (multiple of 128)
TM = 64                      # row tile; grid = M//TM >= 2 (shards across v7x's 2 TCs)
NEG_INF = -1e30              # bias fill for padded vocab lanes


# ---------------------------------------------------------------------------
# Pallas kernel
# ---------------------------------------------------------------------------
def linear_logsoftmax_kernel(feat_ref, scale_ref, w_ref, b_ref, o_ref):
    """out = log_softmax((feat * scale) @ W + b, axis=-1).

    feat_ref : [TM, 1]     f32   per-row feature (conformer stand-in input)
    scale_ref: [1, D]      f32   fused per-feature projection (feat_proj)
    w_ref    : [D, V_PAD]  bf16  final_linear weight, zero-padded past V
    b_ref    : [1, V_PAD]  f32   final_linear bias, NEG_INF-padded past V
    o_ref    : [TM, V_PAD] f32   log-probs (pad lanes ~NEG_INF, sliced in wrapper)
    """
    # Fused feat_proj: [TM,1] * [1,D] -> [TM,D] on the VPU (free vs MXU/store slots).
    x = feat_ref[...] * scale_ref[...]
    # bf16 operands, f32 accumulation on the MXU.
    logits = jnp.dot(x.astype(w_ref.dtype), w_ref[...],
                     preferred_element_type=jnp.float32)
    logits = logits + b_ref[...]                       # padded lanes -> ~NEG_INF
    m = jnp.max(logits, axis=-1, keepdims=True)        # XLU row reduce
    shifted = logits - m
    lse = jnp.log(jnp.sum(jnp.exp(shifted), axis=-1, keepdims=True))  # EUP + XLU
    o_ref[...] = shifted - lse                         # lane-dense full vst


# ---------------------------------------------------------------------------
# Wrappers
# ---------------------------------------------------------------------------
@functools.partial(jax.jit, static_argnames=("tm",))
def final_linear_log_softmax(feats_bt, feat_proj_d, w_pad, b_pad, *, tm=TM):
    """feats_bt: [B, T] f32 -> log_probs [B, T, V]; feat_proj fused in-kernel."""
    Bx, Tx = feats_bt.shape
    Dx = feat_proj_d.shape[0]
    Vp = w_pad.shape[1]
    M = Bx * Tx
    m_pad = -(-M // tm) * tm
    feats_col = feats_bt.reshape(M, 1)
    if m_pad != M:
        feats_col = jnp.pad(feats_col, ((0, m_pad - M), (0, 0)))

    # TODO(synk): for production vocab sizes (V~5-10k) tile V with a second grid
    # axis or keep weights bf16 + raise vmem_limit_bytes (mandatory on v7x's
    # 64 MiB VMEM); resident [D, V_PAD] weight is fine at demo sizes.
    out = pl.pallas_call(
        linear_logsoftmax_kernel,
        out_shape=jax.ShapeDtypeStruct((m_pad, Vp), jnp.float32),
        grid_spec=pltpu.PrefetchScalarGridSpec(
            num_scalar_prefetch=0,
            grid=(m_pad // tm,),
            in_specs=[
                pl.BlockSpec((tm, 1), lambda i: (i, 0)),    # per-row feature
                pl.BlockSpec((1, Dx), lambda i: (0, 0)),    # fused feat_proj
                pl.BlockSpec((Dx, Vp), lambda i: (0, 0)),   # resident bf16 weight
                pl.BlockSpec((1, Vp), lambda i: (0, 0)),    # bias (NEG_INF pad)
            ],
            out_specs=pl.BlockSpec((tm, Vp), lambda i: (i, 0)),
        ),
        compiler_params=pltpu.CompilerParams(
            dimension_semantics=("parallel",),
        ),
    )(feats_col, feat_proj_d.reshape(1, Dx), w_pad, b_pad.reshape(1, Vp))

    # Drop row padding and vocab-lane padding in the wrapper (cheap XLA slice).
    return out[:M, :V].reshape(Bx, Tx, V)


def conformer_ctc_forward(audio_features, audio_features_len, params):
    """
    audio_features:     [B, T, F=1]
    audio_features_len: [B]
    returns: (log_probs_list, seq_lens)  -- eval-mode semantics of ConformerCTCModel
    """
    feats = jnp.squeeze(audio_features, axis=-1)       # [B, T]  (torch.squeeze(..., -1))
    # TODO(synk): feature_extraction / specaugment / conformer are external
    # ModuleFactoryV1 submodules not defined in this file; a fixed deterministic
    # per-feature projection to [B, T, D] stands in and is fused into the kernel.

    # torch.sum(lengths_to_padding_mask(lengths), dim=1) is analytically the
    # (T-clamped) lengths -> plain JAX, no kernel launch (lengths <= T assumed upstream).
    seq_lens = jnp.minimum(audio_features_len.astype(jnp.int32), T)

    log_probs = final_linear_log_softmax(
        feats, params["feat_proj"], params["final_w_pad"], params["final_b_pad"]
    )
    log_probs_list = [log_probs]                       # eval mode: only the final head
    return log_probs_list, seq_lens


# ---------------------------------------------------------------------------
if __name__ == "__main__":
    key = jax.random.PRNGKey(0)
    k1, k2, k3, k4 = jax.random.split(key, 4)

    audio_features = jax.random.normal(k1, (B, T, 1), dtype=jnp.float32)
    audio_features_len = jnp.array([T, T - 5], dtype=jnp.int32)

    feat_proj = jax.random.normal(k2, (D,), jnp.float32) * 0.1
    final_w = jax.random.normal(k3, (D, V), jnp.float32) * (1.0 / jnp.sqrt(D))
    final_b = jax.random.normal(k4, (V,), jnp.float32) * 0.01

    # Lane-dense padding: zero weight columns, NEG_INF bias past the real vocab,
    # bf16 weights (halves weight DMA bytes, doubles MXU throughput).
    final_w_pad = jnp.pad(final_w, ((0, 0), (0, V_PAD - V))).astype(jnp.bfloat16)
    final_b_pad = jnp.pad(final_b, (0, V_PAD - V), constant_values=NEG_INF)

    params = {
        "feat_proj": feat_proj,
        "final_w_pad": final_w_pad,
        "final_b_pad": final_b_pad,
    }

    log_probs_list, seq_lens = conformer_ctc_forward(
        audio_features, audio_features_len, params
    )
    jax.block_until_ready((log_probs_list, seq_lens))

    # Reference check (plain JAX, f32 weights).
    feats_ref = jnp.squeeze(audio_features, -1)[..., None] * feat_proj[None, None, :]
    ref_logits = feats_ref @ final_w + final_b
    ref_log_probs = jax.nn.log_softmax(ref_logits, axis=-1)

    out = log_probs_list[-1]
    assert out.shape == (B, T, V), out.shape
    max_err = float(jnp.max(jnp.abs(out - ref_log_probs)))
    assert jnp.allclose(out, ref_log_probs, atol=2e-2), f"log_softmax mismatch (max_err={max_err})"
    assert jnp.array_equal(seq_lens, audio_features_len), "sequence length mismatch"

    print("KERNEL_OK")
</pallas_src>

<mosaic_0001>
module attributes {stable_mosaic.version = 11 : i64} {
  func.func @linear_logsoftmax_kernel(%arg0: i32, %arg1: memref<64x1xf32, #tpu.memory_space<vmem>>, %arg2: memref<1x128xf32, #tpu.memory_space<vmem>>, %arg3: memref<128x128xbf16, #tpu.memory_space<vmem>>, %arg4: memref<1x128xf32, #tpu.memory_space<vmem>>, %arg5: memref<64x128xf32, #tpu.memory_space<vmem>>) attributes {dimension_semantics = [#tpu.dimension_semantics<parallel>], iteration_bounds = array<i64: 2>, scalar_prefetch = 0 : i64, scratch_operands = 0 : i64, tpu.core_type = #tpu.core_type<tc>, window_params = [{transform_indices = @transform_0, window_bounds = array<i64: 64, 1>}, {pipeline_mode = #tpu.pipeline_mode<synchronous>, transform_indices = @transform_1, window_bounds = array<i64: 1, 128>}, {pipeline_mode = #tpu.pipeline_mode<synchronous>, transform_indices = @transform_2, window_bounds = array<i64: 128, 128>}, {pipeline_mode = #tpu.pipeline_mode<synchronous>, transform_indices = @transform_3, window_bounds = array<i64: 1, 128>}, {transform_indices = @transform_4, window_bounds = array<i64: 64, 128>}]} {
    %c0 = arith.constant 0 : index
    %c0_0 = arith.constant 0 : index
    %0 = vector.load %arg1[%c0, %c0_0] : memref<64x1xf32, #tpu.memory_space<vmem>>, vector<64x1xf32>
    %c0_1 = arith.constant 0 : index
    %c0_2 = arith.constant 0 : index
    %1 = vector.load %arg2[%c0_1, %c0_2] : memref<1x128xf32, #tpu.memory_space<vmem>>, vector<1x128xf32>
    %2 = vector.broadcast %0 : vector<64x1xf32> to vector<64x128xf32>
    %3 = vector.broadcast %1 : vector<1x128xf32> to vector<64x128xf32>
    %4 = arith.mulf %2, %3 : vector<64x128xf32>
    %5 = arith.truncf %4 : vector<64x128xf32> to vector<64x128xbf16>
    %c0_3 = arith.constant 0 : index
    %c0_4 = arith.constant 0 : index
    %6 = vector.load %arg3[%c0_3, %c0_4] : memref<128x128xbf16, #tpu.memory_space<vmem>>, vector<128x128xbf16>
    %cst = arith.constant dense<0.000000e+00> : vector<64x128xf32>
    %7 = tpu.matmul %5, %6, %cst {dimension_numbers = #tpu.dot_dimension_numbers<[1], [0], [0], [1], [0, 0, 1, 1], [], []>} : vector<64x128xbf16>, vector<128x128xbf16>, vector<64x128xf32> -> vector<64x128xf32>
    %c0_5 = arith.constant 0 : index
    %c0_6 = arith.constant 0 : index
    %8 = vector.load %arg4[%c0_5, %c0_6] : memref<1x128xf32, #tpu.memory_space<vmem>>, vector<1x128xf32>
    %9 = vector.broadcast %8 : vector<1x128xf32> to vector<64x128xf32>
    %10 = arith.addf %7, %9 : vector<64x128xf32>
    %cst_7 = arith.constant dense<0xFF800000> : vector<64xf32>
    %11 = vector.multi_reduction <maximumf>, %10, %cst_7 [1] : vector<64x128xf32> to vector<64xf32>
    %12 = vector.shape_cast %11 : vector<64xf32> to vector<64x1xf32>
    %13 = vector.broadcast %12 : vector<64x1xf32> to vector<64x128xf32>
    %14 = arith.subf %10, %13 : vector<64x128xf32>
    %15 = math.exp %14 : vector<64x128xf32>
    %cst_8 = arith.constant dense<0.000000e+00> : vector<64xf32>
    %16 = vector.multi_reduction <add>, %15, %cst_8 [1] : vector<64x128xf32> to vector<64xf32>
    %17 = vector.shape_cast %16 : vector<64xf32> to vector<64x1xf32>
    %18 = math.log %17 : vector<64x1xf32>
    %19 = vector.broadcast %18 : vector<64x1xf32> to vector<64x128xf32>
    %20 = arith.subf %14, %19 : vector<64x128xf32>
    %c0_9 = arith.constant 0 : index
    %c0_10 = arith.constant 0 : index
    %21 = vector.load %arg5[%c0_9, %c0_10] : memref<64x128xf32, #tpu.memory_space<vmem>>, vector<64x128xf32>
    tpu.vector_store %arg5[%c0_9, %c0_10], %20 {strides = array<i32>} : memref<64x128xf32, #tpu.memory_space<vmem>>, vector<64x128xf32>,
    return
  }
  func.func @transform_0(%arg0: i32) -> (i32, i32) {
    %c0_i32 = arith.constant 0 : i32
    %c0_i32_0 = arith.constant 0 : i32
    return %arg0, %c0_i32 : i32, i32
  }
  func.func @transform_1(%arg0: i32) -> (i32, i32) {
    %c0_i32 = arith.constant 0 : i32
    %c0_i32_0 = arith.constant 0 : i32
    %c0_i32_1 = arith.constant 0 : i32
    return %c0_i32, %c0_i32_0 : i32, i32
  }
  func.func @transform_2(%arg0: i32) -> (i32, i32) {
    %c0_i32 = arith.constant 0 : i32
    %c0_i32_0 = arith.constant 0 : i32
    %c0_i32_1 = arith.constant 0 : i32
    return %c0_i32, %c0_i32_0 : i32, i32
  }
  func.func @transform_3(%arg0: i32) -> (i32, i32) {
    %c0_i32 = arith.constant 0 : i32
    %c0_i32_0 = arith.constant 0 : i32
    %c0_i32_1 = arith.constant 0 : i32
    return %c0_i32, %c0_i32_0 : i32, i32
  }
  func.func @transform_4(%arg0: i32) -> (i32, i32) {
    %c0_i32 = arith.constant 0 : i32
    %c0_i32_0 = arith.constant 0 : i32
    return %arg0, %c0_i32 : i32, i32
  }
}

</mosaic_0001>

<bundles_post_ra>
// kernel: final_linear_log_softmax.1
= control target key start
LH: loop header
LB: loop body
LE: loop exit
PB: predicated region body
PF: predicated region fallthrough
CT: control target
= control target key end

     0   :  { %s661_s15 = smov 0   ;;  %s751_s0 = inlined_call_operand.vmem [shape: f32[128,1], index: 0, kind: input, shape index: {}]   ;;  %s752_s1 = inlined_call_operand.vmem [shape: f32[1,128], index: 1, kind: input, shape index: {}]   ;;  %s753_s2 = inlined_call_operand.vmem [shape: bf16[128,128], index: 2, kind: input, shape index: {}]   ;;  %s754_s3 = inlined_call_operand.vmem [shape: f32[1,128], index: 3, kind: input, shape index: {}]   ;;  %s755_s4 = inlined_call_operand.vmem [shape: f32[128,128], index: 4, kind: output, shape index: {}]  }
   0x1 LB: > { %s506_s16 = sadd.s32 4294967295, %s633_s15   ;;  %p510_p0 = scmp.ge.s32.totalorder %s633_s15, 1  ;;  %s633_s15 = sphi %s661_s15, %s14_s15  }
   0x2   : > { %p163_p1 = scmp.lt.s32.totalorder %s633_s15, 3 }
   0x4   : > { %p164_p2 = pnand %p510_p0, %p163_p1 }
   0x5   : > { %s511_s17 = sshll.u32 (!%p164_p2), %s506_s16, 3 }
   0x6   : > { %167 = sbr.rel (%p164_p2) target bundleno = 551 (0x227), region = 36  ;;  %p190_p3 = scmp.lt.s32.totalorder (!%p164_p2), %s511_s17, 15 }
   0xb   : > { %v556_v0 = vld [vmem:[%s753_s2 + $0x38] sm:$0xff]  ;;  %v635_v1 = vmov 0   ;;  %v555_v2 = vld [vmem:[%s753_s2 + $0x30] sm:$0xff]  ;;  %s757_s17 = smov (!%p190_p3, %s511_s17), 15  ;;  %v554_v3 = vld [vmem:[%s753_s2 + $0x28] sm:$0xff] }
   0xc   : > { %592 = vset.pattern.permute.xlu2 %v635_v1  ;;  %591 = vset.pattern.permute.xlu1 %v635_v1  ;;  %s512_s22 = sshll.u32 %s757_s17, 3  ;;  %v553_v7 = vld [vmem:[%s753_s2 + $0x20] sm:$0xff]  ;;  %v552_v11 = vld [vmem:[%s753_s2 + $0x18] sm:$0xff]  ;;  %v551_v14 = vld [vmem:[%s753_s2 + $0x10] sm:$0xff] }
   0xd   : > { %590 = vset.pattern.permute.xlu0 %v635_v1  ;;  %333 = vmatpush.bf16.msra.mxu0 %v556_v0  ;;  %s683_s25 = scalar_lea.vmem %s751_s0, %s512_s22  ;;  %v550_v15 = vld [vmem:[%s753_s2 + $0x8] sm:$0xff]  ;;  %v549_v16 = vld [vmem:[%s753_s2] sm:$0xff]  ;;  %s734_s20 = scalar_lea.vmem %s755_s4, %s512_s22 }
   0xe   : > { %558 = vmatpush.bf16.msra.mxu2 %v556_v0  ;;  %559 = vmatpush.bf16.msra.mxu3 %v556_v0  ;;  %v207_v4 = vld [vmem:[%s683_s25 + $0x30] sm:$0xff]  ;;  %v205_v5 = vld [vmem:[%s683_s25 + $0x20] sm:$0xff]  ;;  %v208_v8 = vld [vmem:[%s683_s25 + $0x38] sm:$0xff] }
   0xf   : > { %557 = vmatpush.bf16.msra.mxu1 %v556_v0  ;;  %v201_v6 = vld [vmem:[%s683_s25] sm:$0xff]  ;;  %242 = vperm.xlu1 %591, %v207_v4   ;;  %v206_v9 = vld [vmem:[%s683_s25 + $0x28] sm:$0xff]  ;;  %v204_v12 = vld [vmem:[%s683_s25 + $0x18] sm:$0xff] }
  0x10   : > { %232 = vperm.xlu0 %590, %v205_v5   ;;  %212 = vperm.xlu2 %592, %v201_v6   ;;  %v202_v10 = vld [vmem:[%s683_s25 + $0x8] sm:$0xff]  ;;  %v203_v13 = vld [vmem:[%s683_s25 + $0x10] sm:$0xff]  ;;  %v593_v18 = vld [vmem:[%s752_s1] ss:$0 sm:$0xff] }
  0x11   : > { %334 = vmatpush.bf16.msra.mxu0 %v555_v2  ;;  %v594_v38 = vld [vmem:[%s754_s3] ss:$0 sm:$0xff] }
  0x12   : > { %561 = vmatpush.bf16.msra.mxu2 %v555_v2  ;;  %562 = vmatpush.bf16.msra.mxu3 %v555_v2 }
  0x13   : > { %560 = vmatpush.bf16.msra.mxu1 %v555_v2 }
  0x15   : > { %335 = vmatpush.bf16.msra.mxu0 %v554_v3 }
  0x16   : > { %564 = vmatpush.bf16.msra.mxu2 %v554_v3  ;;  %565 = vmatpush.bf16.msra.mxu3 %v554_v3 }
  0x17   : > { %563 = vmatpush.bf16.msra.mxu1 %v554_v3  ;;  %247 = vperm.xlu1 %591, %v208_v8  }
  0x18   : > { %237 = vperm.xlu0 %590, %v206_v9   ;;  %217 = vperm.xlu2 %592, %v202_v10  }
  0x19   : > { %336 = vmatpush.bf16.msra.mxu0 %v553_v7 }
  0x1a   : > { %567 = vmatpush.bf16.msra.mxu2 %v553_v7  ;;  %568 = vmatpush.bf16.msra.mxu3 %v553_v7 }
  0x1b   : > { %566 = vmatpush.bf16.msra.mxu1 %v553_v7 }
  0x1d   : > { %337 = vmatpush.bf16.msra.mxu0 %v552_v11 }
  0x1e   : > { %570 = vmatpush.bf16.msra.mxu2 %v552_v11  ;;  %571 = vmatpush.bf16.msra.mxu3 %v552_v11 }
  0x1f   : > { %569 = vmatpush.bf16.msra.mxu1 %v552_v11  ;;  %227 = vperm.xlu1 %591, %v204_v12  }
  0x20   : > { %222 = vperm.xlu0 %590, %v203_v13  }
  0x21   : > { %338 = vmatpush.bf16.msra.mxu0 %v551_v14 }
  0x22   : > { %573 = vmatpush.bf16.msra.mxu2 %v551_v14  ;;  %574 = vmatpush.bf16.msra.mxu3 %v551_v14 }
  0x23   : > { %572 = vmatpush.bf16.msra.mxu1 %v551_v14 }
  0x25   : > { %339 = vmatpush.bf16.msra.mxu0 %v550_v15 }
  0x26   : > { %576 = vmatpush.bf16.msra.mxu2 %v550_v15  ;;  %577 = vmatpush.bf16.msra.mxu3 %v550_v15 }
  0x27   : > { %575 = vmatpush.bf16.msra.mxu1 %v550_v15 }
  0x29   : > { %340 = vmatpush.bf16.msra.mxu0 %v549_v16 }
  0x2a   : > { %579 = vmatpush.bf16.msra.mxu2 %v549_v16  ;;  %580 = vmatpush.bf16.msra.mxu3 %v549_v16 }
  0x2b   : > { %578 = vmatpush.bf16.msra.mxu1 %v549_v16 }
  0x6a   : > { %v213_v17 = vpop.permute.xlu2 %212 }
  0x6b   : > { %v253_v19 = vmul.f32 %v593_v18, %v213_v17 }
  0x72   : > { %v218_v20 = vpop.permute.xlu2 %217 }
  0x73   : > { %v254_v21 = vmul.f32 %v593_v18, %v218_v20 }
  0x75   : > { %v261_v22 = vpack.c.bf16 %v254_v21, %v253_v19 }
  0x77   : > { %341 = vmatmul.bf16.vlgmr.msra.gmra.mxu0 %v261_v22 }
  0x81   : > { %v243_v23 = vpop.permute.xlu1 %242 }
  0x82   : > { %v233_v24 = vpop.permute.xlu0 %232  ;;  %v259_v27 = vmul.f32 %v593_v18, %v243_v23 }
  0x83   : > { %v257_v28 = vmul.f32 %v593_v18, %v233_v24 }
  0x89   : > { %v248_v25 = vpop.permute.xlu1 %247 }
  0x8a   : > { %v238_v26 = vpop.permute.xlu0 %237  ;;  %v260_v29 = vmul.f32 %v593_v18, %v248_v25 }
  0x8b   : > { %v258_v30 = vmul.f32 %v593_v18, %v238_v26 }
  0x8c   : > { %v264_v32 = vpack.c.bf16 %v260_v29, %v259_v27 }
  0x8d   : > { %v263_v31 = vpack.c.bf16 %v258_v30, %v257_v28 }
  0x8e   : > { %356 = vmatmul.bf16.vlgmr.msra.gmra.mxu3 %v264_v32 }
  0x8f   : > { %351 = vmatmul.bf16.vlgmr.msra.gmra.mxu2 %v263_v31 }
  0x91   : > { %v228_v33 = vpop.permute.xlu1 %227 }
  0x92   : > { %v223_v34 = vpop.permute.xlu0 %222  ;;  %v256_v35 = vmul.f32 %v593_v18, %v228_v33 }
  0x93   : > { %v255_v36 = vmul.f32 %v593_v18, %v223_v34 }
  0x95   : > { %v262_v37 = vpack.c.bf16 %v256_v35, %v255_v36 }
  0x97   : > { %346 = vmatmul.bf16.vlgmr.msra.gmra.mxu1 %v262_v37 }
  0xf4   : > { %v342_v39 = vpop.f32.mrf.mxu0 }
  0xf5   : > { %v343_v40 = vadd.f32 %v594_v38, %v342_v39 }
  0xf7   : > { %362 = vmax.xlane.f32.xlu2 %v343_v40 }
  0xfc   : > { %v344_v41 = vpop.f32.mrf.mxu0 }
  0xfd   : > { %v345_v42 = vadd.f32 %v594_v38, %v344_v41 }
  0xff   : > { %364 = vmax.xlane.f32.xlu0 %v345_v42 }
 0x111   : > { %v357_v47 = vpop.f32.mrf.mxu3 }
 0x112   : > { %v352_v43 = vpop.f32.mrf.mxu2  ;;  %v358_v51 = vadd.f32 %v594_v38, %v357_v47 }
 0x113   : > { %v353_v44 = vadd.f32 %v594_v38, %v352_v43 }
 0x114   : > { %v347_v45 = vpop.f32.mrf.mxu1 }
 0x115   : > { %v348_v46 = vadd.f32 %v594_v38, %v347_v45  ;;  %370 = vmax.xlane.f32.xlu2 %v353_v44 }
 0x117   : > { %366 = vmax.xlane.f32.xlu1 %v348_v46 }
 0x119   : > { %v359_v53 = vpop.f32.mrf.mxu3 }
 0x11a   : > { %v354_v48 = vpop.f32.mrf.mxu2  ;;  %v360_v54 = vadd.f32 %v594_v38, %v359_v53 }
 0x11b   : > { %v355_v49 = vadd.f32 %v594_v38, %v354_v48 }
 0x11c   : > { %v349_v50 = vpop.f32.mrf.mxu1 }
 0x11d   : > { %v350_v52 = vadd.f32 %v594_v38, %v349_v50  ;;  %372 = vmax.xlane.f32.xlu0 %v355_v49 }
 0x11f   : > { %374 = vmax.xlane.f32.xlu1 %v358_v51  ;;  %368 = vmax.xlane.f32.xlu2 %v350_v52 }
 0x127   : > { %376 = vmax.xlane.f32.xlu2 %v360_v54 }
 0x16a   : > { %v363_v55 = vpop.xlane.xlu2 %362 }
 0x16b   : > { %v378_v56 = vsub.f32 %v343_v40, %v363_v55 }
 0x16d   : > { %v386_v57 = vmul.f32 1.442695, %v378_v56 }
 0x16f   : > { %595 = vpow2.f32 %v386_v57 }
 0x172   : > { %v365_v59 = vpop.xlane.xlu0 %364 }
 0x173   : > { %v717_v1 = vsub.f32 %v345_v42, %v365_v59 }
 0x175   : > { %v596_v58 = vpop.eup %595  ;;  %v388_v4 = vmul.f32 1.442695, %v717_v1 }
 0x176   : > { %402 = vadd.xlane.f32.xlu0 %v596_v58 }
 0x188   : > { %v371_v60 = vpop.xlane.xlu2 %370 }
 0x189   : > { %v382_v61 = vsub.f32 %v353_v44, %v371_v60 }
 0x18a   : > { %v367_v62 = vpop.xlane.xlu1 %366 }
 0x18b   : > { %v394_v63 = vmul.f32 1.442695, %v382_v61  ;;  %v380_v0 = vsub.f32 %v348_v46, %v367_v62 }
 0x18d   : > { %597 = vpow2.f32 %v394_v63  ;;  %v390_v2 = vmul.f32 1.442695, %v380_v0 }
 0x18f   : > { %599 = vpow2.f32 %v390_v2 }
 0x190   : > { %v373_v3 = vpop.xlane.xlu0 %372  ;;  %601 = vpow2.f32 %v388_v4 }
 0x191   : > { %v720_v5 = vsub.f32 %v355_v49, %v373_v3 }
 0x192   : > { %v369_v6 = vpop.xlane.xlu2 %368  ;;  %v375_v11 = vpop.xlane.xlu1 %374 }
 0x193   : > { %v598_v7 = vpop.eup %597  ;;  %v396_v8 = vmul.f32 1.442695, %v720_v5  ;;  %v723_v9 = vsub.f32 %v350_v52, %v369_v6  ;;  %v726_v13 = vsub.f32 %v358_v51, %v375_v11 }
 0x194   : > { %410 = vadd.xlane.f32.xlu1 %v598_v7 }
 0x195   : > { %v600_v10 = vpop.eup %599  ;;  %v392_v12 = vmul.f32 1.442695, %v723_v9  ;;  %603 = vpow2.f32 %v396_v8  ;;  %v398_v17 = vmul.f32 1.442695, %v726_v13 }
 0x196   : > { %406 = vadd.xlane.f32.xlu2 %v600_v10  ;;  %v602_v15 = vpop.eup %601 }
 0x197   : > { %605 = vpow2.f32 %v392_v12 }
 0x19a   : > { %v377_v14 = vpop.xlane.xlu2 %376 }
 0x19b   : > { %v385_v16 = vsub.f32 %v360_v54, %v377_v14  ;;  %v604_v18 = vpop.eup %603 }
 0x19c   : > { %404 = vadd.xlane.f32.xlu1 %v602_v15 }
 0x19d   : > { %v400_v19 = vmul.f32 1.442695, %v385_v16  ;;  %v606_v20 = vpop.eup %605 }
 0x19e   : > { %412 = vadd.xlane.f32.xlu2 %v604_v18  ;;  %408 = vadd.xlane.f32.xlu0 %v606_v20 }
 0x19f   : > { %607 = vpow2.f32 %v400_v19 }
 0x1a0   : > { %609 = vpow2.f32 %v398_v17 }
 0x1a5   : > { %v608_v21 = vpop.eup %607 }
 0x1a6   : > { %v610_v22 = vpop.eup %609  ;;  %416 = vadd.xlane.f32.xlu1 %v608_v21 }
 0x1a7   : > { %414 = vadd.xlane.f32.xlu0 %v610_v22 }
 0x1e9   : > { %v403_v23 = vpop.xlane.xlu0 %402 }
 0x1ea   : > { %611 = vlog2.f32 %v403_v23 }
 0x1f0   : > { %v612_v24 = vpop.eup %611 }
 0x1f1   : > { %v419_v25 = vmul.f32 0.6931472, %v612_v24 }
 0x1f3   : > { %v434_v26 = vsub.f32 %v378_v56, %v419_v25 }
 0x1f5   : > { %442 = vst [vmem:[%s734_s20] sm:$0xff] %v434_v26 }
 0x207   : > { %v411_v27 = vpop.xlane.xlu1 %410 }
 0x208   : > { %613 = vlog2.f32 %v411_v27 }
 0x209   : > { %v407_v28 = vpop.xlane.xlu2 %406 }
 0x20a   : > { %615 = vlog2.f32 %v407_v28 }
 0x20e   : > { %v614_v29 = vpop.eup %613 }
 0x20f   : > { %v427_v30 = vmul.f32 0.6931472, %v614_v29  ;;  %v405_v31 = vpop.xlane.xlu1 %404 }
 0x210   : > { %v616_v32 = vpop.eup %615  ;;  %617 = vlog2.f32 %v405_v31 }
 0x211   : > { %v438_v33 = vsub.f32 %v382_v61, %v427_v30  ;;  %v423_v34 = vmul.f32 0.6931472, %v616_v32  ;;  %v413_v35 = vpop.xlane.xlu2 %412  ;;  %v409_v36 = vpop.xlane.xlu0 %408 }
 0x212   : > { %619 = vlog2.f32 %v413_v35 }
 0x213   : > { %446 = vst [vmem:[%s734_s20 + $0x20] sm:$0xff] %v438_v33  ;;  %v436_v37 = vsub.f32 %v380_v0, %v423_v34  ;;  %621 = vlog2.f32 %v409_v36 }
 0x215   : > { %444 = vst [vmem:[%s734_s20 + $0x10] sm:$0xff] %v436_v37 }
 0x216   : > { %v618_v38 = vpop.eup %617 }
 0x217   : > { %v421_v39 = vmul.f32 0.6931472, %v618_v38 }
 0x218   : > { %v620_v40 = vpop.eup %619 }
 0x219   : > { %v622_v41 = vpop.eup %621  ;;  %v435_v42 = vsub.f32 %v717_v1, %v421_v39  ;;  %v429_v43 = vmul.f32 0.6931472, %v620_v40  ;;  %v417_v44 = vpop.xlane.xlu1 %416 }
 0x21a   : > { %v425_v45 = vmul.f32 0.6931472, %v622_v41  ;;  %v415_v46 = vpop.xlane.xlu0 %414  ;;  %623 = vlog2.f32 %v417_v44 }
 0x21b   : > { %443 = vst [vmem:[%s734_s20 + $0x8] sm:$0xff] %v435_v42  ;;  %v439_v47 = vsub.f32 %v720_v5, %v429_v43  ;;  %625 = vlog2.f32 %v415_v46 }
 0x21c   : > { %v437_v48 = vsub.f32 %v723_v9, %v425_v45 }
 0x21d   : > { %447 = vst [vmem:[%s734_s20 + $0x28] sm:$0xff] %v439_v47 }
 0x21e   : > { %445 = vst [vmem:[%s734_s20 + $0x18] sm:$0xff] %v437_v48 }
 0x220   : > { %v624_v49 = vpop.eup %623 }
 0x221   : > { %v626_v50 = vpop.eup %625  ;;  %v433_v51 = vmul.f32 0.6931472, %v624_v49 }
 0x222   : > { %v431_v52 = vmul.f32 0.6931472, %v626_v50 }
 0x223   : > { %v441_v53 = vsub.f32 %v385_v16, %v433_v51 }
 0x224   : > { %v440_v54 = vsub.f32 %v726_v13, %v431_v52 }
 0x225   : > { %449 = vst [vmem:[%s734_s20 + $0x38] sm:$0xff] %v441_v53 }
 0x226   : > { %448 = vst [vmem:[%s734_s20 + $0x30] sm:$0xff] %v440_v54 }
 0x227 PF: > { %s14_s15 = sadd.s32 1, %s633_s15  }
 0x228   : > { %p11_p4 = scmp.ge.s32.totalorder %s14_s15, 4  }
 0x22a   :  { %13 = sbr.rel (!%p11_p4) target bundleno = 1 (0x1), region = 66 }

</bundles_post_ra>
